<compile_context>
chip_gen: v5e
topology: v5e:2x2
jax: 0.10.0
libtpu: 0.0.40
codegen_flags: <defaults>
</compile_context>

<pallas_src>
import jax
import jax.numpy as jnp
from jax import lax
from jax.experimental import pallas as pl
from jax.experimental.pallas import tpu as pltpu


def _round_up(x: int, m: int) -> int:
    return ((x + m - 1) // m) * m


def _cdiv(a: int, b: int) -> int:
    return -(-a // b)


def _default_target_block_bytes() -> int:
    """Per-generation tile target.  Bigger tiles on v7x-class chips (3.2 TB/s HBM,
    64 MiB VMEM/TC) to amortize the ~0.35us/step grid overhead; ~4 MiB elsewhere
    (the measured roofline plateau on v6e).  Falls back safely if the query fails."""
    try:
        info = pltpu.get_tpu_info()
        vmem = int(getattr(info, "vmem_capacity_bytes", 0) or 0)
        if 0 < vmem <= (80 << 20):       # v7x-class: 64 MiB per TensorCore
            return 6 << 20               # 12 MiB double-buffered, well under 48 MiB
    except Exception:
        pass
    return 4 << 20                       # v5e / v6e / unknown


def make_gp_sampled_kernel(emb_choice: int, super_emb: int,
                           *, target_block_bytes: int | None = None):
    """Returns a callable (B, N, D_in) -> (B, super_emb) implementing GPSampled.forward."""
    assert emb_choice <= super_emb, "AutoFormer always has emb_choice <= super_emb"

    def gp_sampled(x: jax.Array) -> jax.Array:
        B, N, D_in = x.shape
        assert emb_choice <= D_in, "emb_choice must not exceed the input feature dim"
        assert N >= 2, "need at least one non-cls token"

        tbb = (target_block_bytes if target_block_bytes is not None
               else _default_target_block_bytes())
        itemsize = jnp.dtype(x.dtype).itemsize

        # ---- Feature read width (DMA-aware). ----
        # Slicing features in the BlockSpec makes the input DMA strided with a
        # per-row segment of r*itemsize bytes.  Only slice when segments are long
        # enough (>= 512 B) and the slice saves a meaningful fraction of bytes
        # (r/D_in <= 0.75); otherwise read full rows and mask in-kernel.
        r = _round_up(emb_choice, 128)
        if r >= D_in:
            Dk = D_in
        else:
            seg_bytes = r * itemsize
            Dk = D_in if (seg_bytes < 512 or 4 * r > 3 * D_in) else r
        need_feature_mask = emb_choice < Dk

        # ---- Batch tile first (output second-to-last dim: multiple of 8 or == B). ----
        row_bytes = N * Dk * itemsize                # one batch row, all tokens read
        if B <= 8:
            TB = B
        else:
            tb_budget = max(8, ((tbb // max(row_bytes, 1)) // 8) * 8)
            tb_mega = _round_up(_cdiv(B, 2), 8)      # >= 2 batch blocks (v7x two TCs)
            TB = max(8, min(tb_budget, tb_mega))
        n_b_blocks = _cdiv(B, TB)

        # ---- Token tile under the per-block byte budget (so TB*TN*Dk <= target). ----
        if TB * row_bytes <= tbb or N <= 8:
            TN = N
        else:
            tn = tbb // (TB * Dk * itemsize)
            TN = min(N, max(8, (tn // 8) * 8))
        n_tok_blocks = _cdiv(N, TN)
        if n_tok_blocks == 1:
            TN = N
        need_token_mask = (n_tok_blocks > 1) and (N % TN != 0)

        # ---- Explicit VMEM budget from actual block sizes (+ headroom). ----
        in_blk_bytes = TB * TN * Dk * itemsize
        out_blk_bytes = TB * Dk * itemsize
        acc_bytes = TB * Dk * 4 if n_tok_blocks > 1 else 0
        vmem_limit = max(2 * in_blk_bytes + 2 * out_blk_bytes + acc_bytes + (4 << 20),
                         8 << 20)

        inv_nm1 = 1.0 / float(N - 1)

        def feature_mask(mean):
            if need_feature_mask:
                col = lax.broadcasted_iota(jnp.int32, (TB, Dk), 1)
                mean = jnp.where(col < emb_choice, mean, 0.0)
            return mean

        if n_tok_blocks == 1:
            # Common case: one token tile per batch block -> no accumulator scratch,
            # no phase branches.  Fused sum -> drop cls -> scale -> mask -> store.
            def kernel(x_ref, o_ref):
                xb = x_ref[...]                                        # (TB, N, Dk)
                s = (jnp.sum(xb, axis=1, dtype=jnp.float32)
                     - xb[:, 0, :].astype(jnp.float32))
                o_ref[...] = feature_mask(s * inv_nm1).astype(o_ref.dtype)

            out = pl.pallas_call(
                kernel,
                out_shape=jax.ShapeDtypeStruct((B, Dk), x.dtype),
                grid=(n_b_blocks,),
                in_specs=[pl.BlockSpec((TB, N, Dk), lambda i: (i, 0, 0))],
                out_specs=pl.BlockSpec((TB, Dk), lambda i: (i, 0)),
                compiler_params=pltpu.CompilerParams(
                    dimension_semantics=("parallel",),
                    vmem_limit_bytes=int(vmem_limit)),
            )(x)
        else:
            last = n_tok_blocks - 1

            def kernel(x_ref, o_ref, acc_ref):
                k = pl.program_id(1)

                def accumulate(s):
                    @pl.when(k == 0)
                    def _():
                        # First token tile: init accumulator and drop the cls token.
                        # "sum all, subtract row 0" keeps the reduction sublane-
                        # aligned (no shifted x[:, 1:, :] copy).
                        acc_ref[...] = s - x_ref[:, 0, :].astype(jnp.float32)

                    @pl.when(k > 0)
                    def _():
                        acc_ref[...] = acc_ref[...] + s

                def finalize():
                    o_ref[...] = feature_mask(acc_ref[...] * inv_nm1).astype(o_ref.dtype)

                if need_token_mask:
                    # Interior tiles: plain f32 sum, zero masking overhead.
                    @pl.when(k < last)
                    def _():
                        accumulate(jnp.sum(x_ref[...], axis=1, dtype=jnp.float32))

                    # Edge tile only: zero out-of-range token rows (undefined
                    # contents) before accumulating; NaN-safe via jnp.where.
                    @pl.when(k == last)
                    def _():
                        tok = last * TN + lax.broadcasted_iota(
                            jnp.int32, (1, TN, Dk), 1)
                        xb = jnp.where(tok < N, x_ref[...], 0)
                        accumulate(jnp.sum(xb, axis=1, dtype=jnp.float32))
                        finalize()
                else:
                    accumulate(jnp.sum(x_ref[...], axis=1, dtype=jnp.float32))

                    @pl.when(k == last)
                    def _():
                        finalize()

            out = pl.pallas_call(
                kernel,
                out_shape=jax.ShapeDtypeStruct((B, Dk), x.dtype),
                grid=(n_b_blocks, n_tok_blocks),
                in_specs=[pl.BlockSpec((TB, TN, Dk), lambda i, k: (i, k, 0))],
                out_specs=pl.BlockSpec((TB, Dk), lambda i, k: (i, 0)),
                scratch_shapes=[pltpu.VMEM((TB, Dk), jnp.float32)],
                compiler_params=pltpu.CompilerParams(
                    dimension_semantics=("parallel", "arbitrary"),
                    vmem_limit_bytes=int(vmem_limit)),
            )(x)

        # Tiny (B, Dk) post-processing: pad/trim feature axis to super_emb.
        if Dk < super_emb:
            out = jnp.pad(out, ((0, 0), (0, super_emb - Dk)))
        elif Dk > super_emb:
            out = out[:, :super_emb]
        return out

    return gp_sampled


def gp_sampled_ref(x, emb_choice, super_emb):
    """Pure-JAX reference mirroring the PyTorch forward (mean computed in f32)."""
    y = jnp.mean(x[:, 1:, :emb_choice].astype(jnp.float32), axis=1)
    if y.shape[-1] != super_emb:
        y = jnp.pad(y, ((0, 0), (0, super_emb - y.shape[-1])))
    return y.astype(x.dtype)


def _check(name, out, ref, B, super_emb, atol, rtol):
    assert out.shape == (B, super_emb), (name, out.shape)
    ok = jnp.allclose(out.astype(jnp.float32), ref.astype(jnp.float32),
                      atol=atol, rtol=rtol)
    assert bool(ok), f"{name}: mismatch vs reference"


if __name__ == "__main__":
    key = jax.random.PRNGKey(0)
    k1, k2, k3, k4 = jax.random.split(key, 4)

    # Test 1: toy shapes (B=2, N=8, D=32), emb_choice=24 < D -> feature-mask path,
    # single token block (no scratch kernel).
    B, N, D = 2, 8, 32
    x1 = jax.random.normal(k1, (B, N, D), dtype=jnp.float32)
    out1 = jax.block_until_ready(make_gp_sampled_kernel(24, 32)(x1))
    _check("test1", out1, gp_sampled_ref(x1, 24, 32), B, 32, 1e-5, 1e-5)

    # Test 2: emb_choice == super_emb == D_in (no masking, no padding).
    out2 = jax.block_until_ready(make_gp_sampled_kernel(32, 32)(x1))
    _check("test2", out2, gp_sampled_ref(x1, 32, 32), B, 32, 1e-5, 1e-5)

    # Test 3: tiny target_block_bytes forces token-axis tiling with a partial edge
    # tile (masked only on the last tile), feature-slicing BlockSpec (Dk=128 < 384),
    # and output padding to super_emb.
    B3, N3, D3 = 3, 20, 384
    x3 = jax.random.normal(k2, (B3, N3, D3), dtype=jnp.float32)
    out3 = jax.block_until_ready(
        make_gp_sampled_kernel(120, 384, target_block_bytes=2048)(x3))
    _check("test3", out3, gp_sampled_ref(x3, 120, 384), B3, 384, 1e-5, 1e-5)

    # Test 4: B=18 > 8 -> batch axis split into >=2 blocks (v7x megacore path) with a
    # partial edge batch block; single token block, no feature mask.
    B4, N4, D4 = 18, 8, 256
    x4 = jax.random.normal(k3, (B4, N4, D4), dtype=jnp.float32)
    out4 = jax.block_until_ready(make_gp_sampled_kernel(256, 256)(x4))
    _check("test4", out4, gp_sampled_ref(x4, 256, 256), B4, 256, 1e-5, 1e-5)

    # Test 5: bf16 input; short strided segments (128*2B < 512B) -> full-row read with
    # in-kernel feature masking; super_emb < Dk exercises the wrapper trim path.
    B5, N5, D5 = 4, 24, 512
    x5 = jax.random.normal(k4, (B5, N5, D5), dtype=jnp.bfloat16)
    out5 = jax.block_until_ready(make_gp_sampled_kernel(128, 256)(x5))
    _check("test5", out5, gp_sampled_ref(x5, 128, 256), B5, 256, 2e-2, 2e-2)

    print("KERNEL_OK")
</pallas_src>

<mosaic_0001>
module attributes {stable_mosaic.version = 11 : i64} {
  func.func @kernel(%arg0: i32, %arg1: memref<2x8x32xf32, #tpu.memory_space<vmem>>, %arg2: memref<2x32xf32, #tpu.memory_space<vmem>>) attributes {dimension_semantics = [#tpu.dimension_semantics<parallel>], iteration_bounds = array<i64: 1>, scalar_prefetch = 0 : i64, scratch_operands = 0 : i64, tpu.core_type = #tpu.core_type<tc>, window_params = [{transform_indices = @transform_0, window_bounds = array<i64: 2, 8, 32>}, {transform_indices = @transform_1, window_bounds = array<i64: 2, 32>}]} {
    %c0 = arith.constant 0 : index
    %c0_0 = arith.constant 0 : index
    %c0_1 = arith.constant 0 : index
    %0 = vector.load %arg1[%c0, %c0_0, %c0_1] : memref<2x8x32xf32, #tpu.memory_space<vmem>>, vector<2x8x32xf32>
    %cst = arith.constant dense<0.000000e+00> : vector<2x32xf32>
    %1 = vector.multi_reduction <add>, %0, %cst [1] : vector<2x8x32xf32> to vector<2x32xf32>
    %2 = vector.extract_strided_slice %0 {offsets = [0, 0, 0], sizes = [2, 1, 32], strides = [1, 1, 1]} : vector<2x8x32xf32> to vector<2x1x32xf32>
    %3 = vector.shape_cast %2 : vector<2x1x32xf32> to vector<2x32xf32>
    %4 = arith.subf %1, %3 : vector<2x32xf32>
    %cst_2 = arith.constant 0.142857149 : f32
    %5 = vector.broadcast %cst_2 : f32 to vector<2x32xf32>
    %6 = arith.mulf %4, %5 : vector<2x32xf32>
    %7 = tpu.iota {dimensions = array<i32: 1>} : vector<2x32xi32>
    %c24_i32 = arith.constant 24 : i32
    %8 = vector.broadcast %c24_i32 : i32 to vector<2x32xi32>
    %9 = arith.cmpi slt, %7, %8 : vector<2x32xi32>
    %cst_3 = arith.constant 0.000000e+00 : f32
    %10 = vector.broadcast %cst_3 : f32 to vector<2x32xf32>
    %11 = arith.select %9, %6, %10 : vector<2x32xi1>, vector<2x32xf32>
    %c0_4 = arith.constant 0 : index
    %c0_5 = arith.constant 0 : index
    %12 = vector.load %arg2[%c0_4, %c0_5] : memref<2x32xf32, #tpu.memory_space<vmem>>, vector<2x32xf32>
    tpu.vector_store %arg2[%c0_4, %c0_5], %11 {strides = array<i32>} : memref<2x32xf32, #tpu.memory_space<vmem>>, vector<2x32xf32>,
    return
  }
  func.func @transform_0(%arg0: i32) -> (i32, i32, i32) {
    %c0_i32 = arith.constant 0 : i32
    %c0_i32_0 = arith.constant 0 : i32
    %c0_i32_1 = arith.constant 0 : i32
    return %arg0, %c0_i32, %c0_i32_0 : i32, i32, i32
  }
  func.func @transform_1(%arg0: i32) -> (i32, i32) {
    %c0_i32 = arith.constant 0 : i32
    %c0_i32_0 = arith.constant 0 : i32
    return %arg0, %c0_i32 : i32, i32
  }
}

</mosaic_0001>

<bundles_post_ra>
// kernel: tpu_custom_call.1
= control target key start
LH: loop header
LB: loop body
LE: loop exit
PB: predicated region body
PF: predicated region fallthrough
CT: control target
= control target key end

     0   :  { %6 = vsyncpa [#allocation3], 0  ;;  %s151_s0 = inlined_call_operand.hbm [shape: f32[2,8,32], index: 0, kind: input, shape index: {}]   ;;  %s152_s1 = inlined_call_operand.hbm [shape: f32[2,32], index: 1, kind: output, shape index: {}]  }
   0x1   :  { %7 = vsyncpa [#allocation4], 0  ;;  %s12_s8 = sshll.u32 %s151_s0, 4  ;;  %s131_s9 = smov [#allocation2]   ;;  %s13_s8 = int_to_ptr.hbm [resolvable:$true] %s12_s8 }
   0x2   :  { %s14_s10 = sshll.u32 %s131_s9, 4  ;;  %s132_s11 = smov 128   ;;  %s15_s10 = int_to_ptr.vmem [resolvable:$true] %s14_s10 }
   0x3   :  { %s133_s12 = smov 8  }
   0x4   :  { %20 = dma.hbm_to_vmem [thread:$0]  %s13_s8, 256, %s15_s10, [#allocation3], %s132_s11, %s132_s11, %s133_s12  }
   0x5   :  { %127 = dma.done.wait [#allocation3], 256  }
   0x6   :  { %128 = vsyncadd [#allocation3], 4294967040  ;;  %vm27_vm0 = vcmask 261120   ;;  %v25_v0 = vld [vmem:[#allocation2] sm:$0xff]  ;;  %v26_v1 = vld [vmem:[#allocation2 + $0x8] sm:$0xff]  ;;  %v46_v14 = vlaneseq  ;;  %vm52_vm1 = vcmask 1041409  }
   0x7   :  { %v28_v2 = vsel %vm27_vm0, %v25_v0, 0.0  ;;  %v35_v3 = vsel %vm27_vm0, %v26_v1, 0.0  ;;  %s134_s0 = smov [#allocation5]   ;;  %s65_s16 = sshll.u32 %s152_s1, 4  ;;  %vm56_vm3 = vcmask 254976   ;;  %s66_s16 = int_to_ptr.hbm [resolvable:$true] %s65_s16 }
   0x8   :  { %v29_v4 = vrot.slane %v28_v2, 4  ;;  %v36_v5 = vrot.slane %v35_v3, 4  ;;  %v47_v19 = vand.u32 127, %v46_v14  ;;  %s63_s13 = sshll.u32 %s134_s0, 4  ;;  %s64_s13 = int_to_ptr.vmem [resolvable:$true] %s63_s13 }
   0xa   :  { %v30_v6 = vadd.f32 %v29_v4, %v28_v2  ;;  %v37_v7 = vadd.f32 %v36_v5, %v35_v3  ;;  %vm48_vm2 = vcmp.lt.s32.totalorder %v47_v19, 24 }
   0xc   :  { %v31_v8 = vrot.slane %v30_v6, 2  ;;  %v38_v9 = vrot.slane %v37_v7, 2 }
   0xe   :  { %v32_v10 = vadd.f32 %v31_v8, %v30_v6  ;;  %v39_v11 = vadd.f32 %v38_v9, %v37_v7 }
  0x10   :  { %v33_v12 = vrot.slane %v32_v10, 1  ;;  %v40_v13 = vrot.slane %v39_v11, 1 }
  0x12   :  { %v34_v15 = vadd.f32 %v33_v12, %v32_v10  ;;  %v41_v16 = vadd.f32 %v40_v13, %v39_v11 }
  0x14   :  { %v42_v17 = vsub.f32 %v34_v15, %v25_v0  ;;  %v43_v18 = vsub.f32 %v41_v16, %v26_v1 }
  0x16   :  { %v44_v20 = vmul.f32 0.14285715, %v42_v17  ;;  %v45_v21 = vmul.f32 0.14285715, %v43_v18 }
  0x18   :  { %v51_v22 = vrot.slane %v45_v21, 7 }
  0x1a   :  { %v53_v23 = vsel %vm52_vm1, %v51_v22, %v44_v20 }
  0x1b   :  { %v55_v24 = vsel %vm48_vm2, %v53_v23, 0.0 }
  0x1c   :  { %57 = vst.msk [vmem:[#allocation5] sm:$0x3] %vm56_vm3, %v55_v24 }
  0x1d   :  { %68 = dma.vmem_to_hbm [thread:$0]  %s64_s13, 32, %s66_s16, [#allocation4]  }
  0x1e   :  { %129 = dma.done.wait [#allocation4], 32  }
  0x1f   :  { %130 = vsyncadd [#allocation4], 4294967264 }
  0x20   :  { %73 = vsyncpa [#allocation3], 1 }
  0x21   :  { %74 = vsyncpa [#allocation4], 1 }

</bundles_post_ra>
